<compile_context>
chip_gen: v7x
topology: tpu7x:2x2x1
jax: 0.10.0
libtpu: 0.0.40
codegen_flags: <defaults>
</compile_context>

<pallas_src>
import jax
import jax.numpy as jnp
from jax.experimental import pallas as pl
from jax.experimental.pallas import tpu as pltpu

HIDDEN = 40  # nn.Linear(state_size, 40), nn.Linear(40, 40), nn.Linear(40, 1)

# bf16 operands + f32 accumulation for the two MXU matmuls (free perf; f32xf32
# would be emulated with multiple bf16 passes anyway).
_MATMUL_DTYPE = jnp.bfloat16


def _critic_kernel(x_ref, w1_ref, b1_ref, w2_ref, b2_ref, w3_ref, b3_ref, out_ref):
    x = x_ref[...]                                                      # (S, TB) f32

    # layer 1: h1 = relu(W1 @ x + b1)            -> (H, TB), lane-dense
    h1 = jnp.dot(w1_ref[...].astype(_MATMUL_DTYPE), x.astype(_MATMUL_DTYPE),
                 preferred_element_type=jnp.float32)
    h1 = jnp.maximum(h1 + b1_ref[...], 0.0)

    # layer 2: h2 = relu(W2 @ h1 + b2)           -> (H, TB), lane-dense
    h2 = jnp.dot(w2_ref[...].astype(_MATMUL_DTYPE), h1.astype(_MATMUL_DTYPE),
                 preferred_element_type=jnp.float32)
    h2 = jnp.maximum(h2 + b2_ref[...], 0.0)

    # head: Linear(40, 1) as VPU multiply + sublane reduce over the 40 features.
    # Produces the (1, TB) lane-dense output slab directly.
    v = jnp.sum(h2 * w3_ref[...], axis=0, keepdims=True) + b3_ref[...]  # (1, TB)

    out_ref[...] = v.astype(out_ref.dtype)


def _round_up(x, m):
    return ((x + m - 1) // m) * m


def _parallel_tiles():
    """TensorCores reachable by one kernel launch via megacore grid sharding."""
    try:
        kind = jax.devices()[0].device_kind.lower()
    except Exception:
        return 1
    if "v7" in kind or "7x" in kind or "v4" in kind:   # megacore: 2 TCs per chip
        return 2
    return 1                                            # v5e / v6e: single TC


def critic_forward_pallas(state, params, *, block_b=16384):
    """state: (B, state_size) f32. Returns value: (B, 1) f32. Always uses the kernel."""
    w1, b1, w2, b2, w3_col, b3 = params
    B, S = state.shape

    # One tile per TensorCore (1 on v5e/v6e, 2 on v7x); tile lane width is a
    # multiple of 128 so every output store is unmasked; cap so f32 activation
    # temporaries (2 * 40 * tb * 4 B) stay well inside scoped VMEM.
    n_par = _parallel_tiles()
    tb = _round_up(max(pl.cdiv(B, n_par), 128), 128)
    tb = min(tb, block_b)
    B_pad = _round_up(B, tb)            # pad -> no partial (masked) last tile
    grid = (B_pad // tb,)

    # Batch-on-lanes layout: x is (S, B_pad). Padded lanes are zeros and flow
    # through row-independent math; they are sliced off after the kernel.
    x_t = state.T
    if B_pad != B:
        x_t = jnp.pad(x_t, ((0, 0), (0, B_pad - B)))

    def const_spec(shape):
        # weights/biases: same full block every grid step -> stay VMEM-resident
        return pl.BlockSpec(shape, lambda i: (0,) * len(shape))

    out = pl.pallas_call(
        _critic_kernel,
        out_shape=jax.ShapeDtypeStruct((1, B_pad), jnp.float32),
        grid=grid,
        in_specs=[
            pl.BlockSpec((S, tb), lambda i: (0, i)),   # x: tiled over batch lanes
            const_spec(w1.shape), const_spec(b1.shape),
            const_spec(w2.shape), const_spec(b2.shape),
            const_spec(w3_col.shape), const_spec(b3.shape),
        ],
        out_specs=pl.BlockSpec((1, tb), lambda i: (0, i)),  # lane-dense output slab
        compiler_params=pltpu.CompilerParams(
            dimension_semantics=("parallel",),  # shards the 2 tiles across TCs on v7x
        ),
    )(x_t, w1, b1, w2, b2, w3_col, b3)

    return out[0, :B].reshape(B, 1)


def critic_reference(state, params):
    """Pure-JAX reference of the PyTorch forward (also the tiny-batch fast path)."""
    w1, b1, w2, b2, w3_col, b3 = params
    h1 = jnp.maximum(state @ w1.T + b1[:, 0], 0.0)
    h2 = jnp.maximum(h1 @ w2.T + b2[:, 0], 0.0)
    return h2 @ w3_col + b3


def _critic_forward_impl(state, params, *, block_b=16384, min_kernel_batch=256):
    """Dispatcher: tiny batches use the fused XLA path (launch overhead dominates);
    larger batches use the batch-on-lanes Pallas kernel."""
    if state.shape[0] < min_kernel_batch:
        return critic_reference(state, params)
    return critic_forward_pallas(state, params, block_b=block_b)


# jit the whole forward so the wrapper-side transpose/pad/slice fuse with the call.
critic_forward = jax.jit(_critic_forward_impl,
                         static_argnames=("block_b", "min_kernel_batch"))
critic_forward_pallas_jit = jax.jit(critic_forward_pallas, static_argnames=("block_b",))


def init_critic_params(key, state_size):
    """PyTorch nn.Linear default init: U(-1/sqrt(fan_in), +1/sqrt(fan_in)).
    Weights are kept PyTorch-native (out, in); biases stored as (out, 1) columns;
    the head weight is stored as a (40, 1) column for the sublane-reduce head."""
    keys = jax.random.split(key, 6)

    def linear(kw, kb, fan_in, fan_out):
        bound = 1.0 / (fan_in ** 0.5)
        w = jax.random.uniform(kw, (fan_out, fan_in), jnp.float32, -bound, bound)
        b = jax.random.uniform(kb, (fan_out, 1), jnp.float32, -bound, bound)
        return w, b

    w1, b1 = linear(keys[0], keys[1], state_size, HIDDEN)
    w2, b2 = linear(keys[2], keys[3], HIDDEN, HIDDEN)
    w3, b3 = linear(keys[4], keys[5], HIDDEN, 1)        # w3: (1, 40), b3: (1, 1)
    return (w1, b1, w2, b2, w3.T, b3)                   # head weight as (40, 1) column


if __name__ == "__main__":
    key = jax.random.PRNGKey(0)
    k_param, k_state = jax.random.split(key)

    state_size = 8     # typical small RL state vector
    params = init_critic_params(k_param, state_size)

    # Main kernel path: 1 full-batch tile on v5e/v6e, 2 parallel tiles on v7x.
    batch = 1024
    state = jax.random.normal(k_state, (batch, state_size), jnp.float32)
    value = jax.block_until_ready(critic_forward_pallas_jit(state, params))
    ref = critic_reference(state, params)
    assert value.shape == (batch, 1)
    # bf16 MXU operands (f32 accumulation) -> compare at bf16-level tolerance.
    assert jnp.allclose(value, ref, atol=5e-2, rtol=5e-2), (value[:4], ref[:4])

    # Batch not a multiple of 128: exercises the wrapper pad + slice path.
    state_odd = jax.random.normal(k_state, (300, state_size), jnp.float32)
    v_odd = jax.block_until_ready(critic_forward_pallas_jit(state_odd, params))
    assert v_odd.shape == (300, 1)
    assert jnp.allclose(v_odd, critic_reference(state_odd, params), atol=5e-2, rtol=5e-2)

    # Tiny-batch regime: dispatcher takes the fused XLA path.
    small_state = jax.random.normal(k_state, (4, state_size), jnp.float32)
    small_value = jax.block_until_ready(critic_forward(small_state, params))
    assert small_value.shape == (4, 1)
    assert jnp.allclose(small_value, critic_reference(small_state, params),
                        atol=1e-5, rtol=1e-5)

    print("KERNEL_OK")
</pallas_src>

<mosaic_0001>
module attributes {stable_mosaic.version = 11 : i64} {
  func.func @_critic_kernel(%arg0: i32, %arg1: memref<8x1024xf32, #tpu.memory_space<vmem>>, %arg2: memref<40x8xf32, #tpu.memory_space<vmem>>, %arg3: memref<40x1xf32, #tpu.memory_space<vmem>>, %arg4: memref<40x40xf32, #tpu.memory_space<vmem>>, %arg5: memref<40x1xf32, #tpu.memory_space<vmem>>, %arg6: memref<40x1xf32, #tpu.memory_space<vmem>>, %arg7: memref<1x1xf32, #tpu.memory_space<vmem>>, %arg8: memref<1x1024xf32, #tpu.memory_space<vmem>>) attributes {dimension_semantics = [#tpu.dimension_semantics<parallel>], iteration_bounds = array<i64: 1>, scalar_prefetch = 0 : i64, scratch_operands = 0 : i64, tpu.core_type = #tpu.core_type<tc>, window_params = [{transform_indices = @transform_0, window_bounds = array<i64: 8, 1024>}, {pipeline_mode = #tpu.pipeline_mode<synchronous>, transform_indices = @transform_1, window_bounds = array<i64: 40, 8>}, {pipeline_mode = #tpu.pipeline_mode<synchronous>, transform_indices = @transform_2, window_bounds = array<i64: 40, 1>}, {pipeline_mode = #tpu.pipeline_mode<synchronous>, transform_indices = @transform_3, window_bounds = array<i64: 40, 40>}, {pipeline_mode = #tpu.pipeline_mode<synchronous>, transform_indices = @transform_4, window_bounds = array<i64: 40, 1>}, {pipeline_mode = #tpu.pipeline_mode<synchronous>, transform_indices = @transform_5, window_bounds = array<i64: 40, 1>}, {pipeline_mode = #tpu.pipeline_mode<synchronous>, transform_indices = @transform_6, window_bounds = array<i64: 1, 1>}, {transform_indices = @transform_7, window_bounds = array<i64: 1, 1024>}]} {
    %c0 = arith.constant 0 : index
    %c0_0 = arith.constant 0 : index
    %0 = vector.load %arg1[%c0, %c0_0] : memref<8x1024xf32, #tpu.memory_space<vmem>>, vector<8x1024xf32>
    %c0_1 = arith.constant 0 : index
    %c0_2 = arith.constant 0 : index
    %1 = vector.load %arg2[%c0_1, %c0_2] : memref<40x8xf32, #tpu.memory_space<vmem>>, vector<40x8xf32>
    %2 = arith.truncf %1 : vector<40x8xf32> to vector<40x8xbf16>
    %3 = arith.truncf %0 : vector<8x1024xf32> to vector<8x1024xbf16>
    %cst = arith.constant dense<0.000000e+00> : vector<40x1024xf32>
    %4 = tpu.matmul %2, %3, %cst {dimension_numbers = #tpu.dot_dimension_numbers<[1], [0], [0], [1], [0, 0, 1, 1], [], []>} : vector<40x8xbf16>, vector<8x1024xbf16>, vector<40x1024xf32> -> vector<40x1024xf32>
    %c0_3 = arith.constant 0 : index
    %c0_4 = arith.constant 0 : index
    %5 = vector.load %arg3[%c0_3, %c0_4] : memref<40x1xf32, #tpu.memory_space<vmem>>, vector<40x1xf32>
    %6 = vector.broadcast %5 : vector<40x1xf32> to vector<40x1024xf32>
    %7 = arith.addf %4, %6 : vector<40x1024xf32>
    %cst_5 = arith.constant 0.000000e+00 : f32
    %8 = vector.broadcast %cst_5 : f32 to vector<40x1024xf32>
    %9 = arith.maximumf %7, %8 : vector<40x1024xf32>
    %c0_6 = arith.constant 0 : index
    %c0_7 = arith.constant 0 : index
    %10 = vector.load %arg4[%c0_6, %c0_7] : memref<40x40xf32, #tpu.memory_space<vmem>>, vector<40x40xf32>
    %11 = arith.truncf %10 : vector<40x40xf32> to vector<40x40xbf16>
    %12 = arith.truncf %9 : vector<40x1024xf32> to vector<40x1024xbf16>
    %cst_8 = arith.constant dense<0.000000e+00> : vector<40x1024xf32>
    %13 = tpu.matmul %11, %12, %cst_8 {dimension_numbers = #tpu.dot_dimension_numbers<[1], [0], [0], [1], [0, 0, 1, 1], [], []>} : vector<40x40xbf16>, vector<40x1024xbf16>, vector<40x1024xf32> -> vector<40x1024xf32>
    %c0_9 = arith.constant 0 : index
    %c0_10 = arith.constant 0 : index
    %14 = vector.load %arg5[%c0_9, %c0_10] : memref<40x1xf32, #tpu.memory_space<vmem>>, vector<40x1xf32>
    %15 = vector.broadcast %14 : vector<40x1xf32> to vector<40x1024xf32>
    %16 = arith.addf %13, %15 : vector<40x1024xf32>
    %cst_11 = arith.constant 0.000000e+00 : f32
    %17 = vector.broadcast %cst_11 : f32 to vector<40x1024xf32>
    %18 = arith.maximumf %16, %17 : vector<40x1024xf32>
    %c0_12 = arith.constant 0 : index
    %c0_13 = arith.constant 0 : index
    %19 = vector.load %arg6[%c0_12, %c0_13] : memref<40x1xf32, #tpu.memory_space<vmem>>, vector<40x1xf32>
    %20 = vector.broadcast %19 : vector<40x1xf32> to vector<40x1024xf32>
    %21 = arith.mulf %18, %20 : vector<40x1024xf32>
    %cst_14 = arith.constant dense<0.000000e+00> : vector<1024xf32>
    %22 = vector.multi_reduction <add>, %21, %cst_14 [0] : vector<40x1024xf32> to vector<1024xf32>
    %23 = vector.shape_cast %22 : vector<1024xf32> to vector<1x1024xf32>
    %c0_15 = arith.constant 0 : index
    %c0_16 = arith.constant 0 : index
    %24 = vector.load %arg7[%c0_15, %c0_16] : memref<1x1xf32, #tpu.memory_space<vmem>>, vector<1x1xf32>
    %25 = vector.broadcast %24 : vector<1x1xf32> to vector<1x1024xf32>
    %26 = arith.addf %23, %25 : vector<1x1024xf32>
    %c0_17 = arith.constant 0 : index
    %c0_18 = arith.constant 0 : index
    %27 = vector.load %arg8[%c0_17, %c0_18] : memref<1x1024xf32, #tpu.memory_space<vmem>>, vector<1x1024xf32>
    tpu.vector_store %arg8[%c0_17, %c0_18], %26 {strides = array<i32>} : memref<1x1024xf32, #tpu.memory_space<vmem>>, vector<1x1024xf32>,
    return
  }
  func.func @transform_0(%arg0: i32) -> (i32, i32) {
    %c0_i32 = arith.constant 0 : i32
    %c0_i32_0 = arith.constant 0 : i32
    return %c0_i32, %arg0 : i32, i32
  }
  func.func @transform_1(%arg0: i32) -> (i32, i32) {
    %c0_i32 = arith.constant 0 : i32
    %c0_i32_0 = arith.constant 0 : i32
    %c0_i32_1 = arith.constant 0 : i32
    return %c0_i32, %c0_i32_0 : i32, i32
  }
  func.func @transform_2(%arg0: i32) -> (i32, i32) {
    %c0_i32 = arith.constant 0 : i32
    %c0_i32_0 = arith.constant 0 : i32
    %c0_i32_1 = arith.constant 0 : i32
    return %c0_i32, %c0_i32_0 : i32, i32
  }
  func.func @transform_3(%arg0: i32) -> (i32, i32) {
    %c0_i32 = arith.constant 0 : i32
    %c0_i32_0 = arith.constant 0 : i32
    %c0_i32_1 = arith.constant 0 : i32
    return %c0_i32, %c0_i32_0 : i32, i32
  }
  func.func @transform_4(%arg0: i32) -> (i32, i32) {
    %c0_i32 = arith.constant 0 : i32
    %c0_i32_0 = arith.constant 0 : i32
    %c0_i32_1 = arith.constant 0 : i32
    return %c0_i32, %c0_i32_0 : i32, i32
  }
  func.func @transform_5(%arg0: i32) -> (i32, i32) {
    %c0_i32 = arith.constant 0 : i32
    %c0_i32_0 = arith.constant 0 : i32
    %c0_i32_1 = arith.constant 0 : i32
    return %c0_i32, %c0_i32_0 : i32, i32
  }
  func.func @transform_6(%arg0: i32) -> (i32, i32) {
    %c0_i32 = arith.constant 0 : i32
    %c0_i32_0 = arith.constant 0 : i32
    %c0_i32_1 = arith.constant 0 : i32
    return %c0_i32, %c0_i32_0 : i32, i32
  }
  func.func @transform_7(%arg0: i32) -> (i32, i32) {
    %c0_i32 = arith.constant 0 : i32
    %c0_i32_0 = arith.constant 0 : i32
    return %c0_i32, %arg0 : i32, i32
  }
}

</mosaic_0001>

<bundles_post_ra>
// kernel: critic_forward_pallas.1
= control target key start
LH: loop header
LB: loop body
LE: loop exit
PB: predicated region body
PF: predicated region fallthrough
CT: control target
= control target key end

     0   :  { %s1501_s0 = inlined_call_operand.vmem [shape: f32[8,1024], index: 0, kind: input, shape index: {}]   ;;  %s1502_s1 = inlined_call_operand.vmem [shape: f32[40,8], index: 1, kind: input, shape index: {}]   ;;  %s1503_s2 = inlined_call_operand.vmem [shape: f32[40,1], index: 2, kind: input, shape index: {}]   ;;  %s1504_s3 = inlined_call_operand.vmem [shape: f32[40,40], index: 3, kind: input, shape index: {}]   ;;  %s1505_s4 = inlined_call_operand.vmem [shape: f32[40,1], index: 4, kind: input, shape index: {}]   ;;  %s1506_s5 = inlined_call_operand.vmem [shape: f32[40,1], index: 5, kind: input, shape index: {}]   ;;  %s1507_s6 = inlined_call_operand.<no memory space> [shape: f32[1,1], index: 6, kind: input, shape index: {}]   ;;  %s1508_s7 = inlined_call_operand.hbm [shape: f32[1,1024], index: 7, kind: output, shape index: {}]  }
   0x1   :  { %v12_v0 = vstv %s1507_s6 }
   0x2   :  { %13 = vst [vmem:[#allocation2] sm:$0x1] %v12_v0 }
   0x3   :  { %v31_v1 = vld [vmem:[%s1501_s0 + $0x8] sm:$0xff]  ;;  %vm94_vm0 = vcmask 1043456   ;;  %v33_v2 = vld [vmem:[%s1501_s0 + $0x18] sm:$0xff]  ;;  %v30_v3 = vld [vmem:[%s1501_s0] sm:$0xff]  ;;  %v1085_v8 = vmov 0   ;;  %vm84_vm1 = vcmask 64512  }
   0x4   :  { %v47_v4 = vpack.c.bf16 %v31_v1, %v31_v1  ;;  %v49_v5 = vpack.c.bf16 %v33_v2, %v33_v2  ;;  %v46_v6 = vpack.c.bf16 %v30_v3, %v30_v3  ;;  %v32_v7 = vld [vmem:[%s1501_s0 + $0x10] sm:$0xff]  ;;  %151 = vmatprep.mubr.bf16.mxu0 %v1085_v8  ;;  %212 = vmatprep.mubr.bf16.mxu1 %v1085_v8  ;;  %v38_v9 = vld [vmem:[%s1502_s1] sm:$0xff]  ;;  %v39_v10 = vld [vmem:[%s1502_s1 + $0x8] sm:$0xff] }
   0x5   :  { %v48_v11 = vpack.c.bf16 %v32_v7, %v32_v7  ;;  %v1151_v12 = vpack.c.bf16 %v39_v10, %v38_v9  ;;  %v35_v13 = vld [vmem:[%s1501_s0 + $0x28] sm:$0xff]  ;;  %v37_v14 = vld [vmem:[%s1501_s0 + $0x38] sm:$0xff]  ;;  %v34_v15 = vld [vmem:[%s1501_s0 + $0x20] sm:$0xff]  ;;  %1059 = vset.pattern.permute.xlu0 %v1085_v8  ;;  %1060 = vset.pattern.permute.xlu1 %v1085_v8 }
   0x6   :  { %1024 = vmatprep.subr.msk.bf16.mxu0 %vm94_vm0, %v47_v4  ;;  %1028 = vmatprep.subr.msk.bf16.mxu1 %vm94_vm0, %v49_v5  ;;  %v96_v16 = vsel %vm94_vm0, %v46_v6, 0  ;;  %v51_v17 = vpack.c.bf16 %v35_v13, %v35_v13  ;;  %v53_v18 = vpack.c.bf16 %v37_v14, %v37_v14  ;;  %v50_v19 = vpack.c.bf16 %v34_v15, %v34_v15  ;;  %v36_v20 = vld [vmem:[%s1501_s0 + $0x30] sm:$0xff]  ;;  %v54_v23 = vld [vmem:[%s1503_s2] sm:$0xff]  ;;  %v55_v27 = vld [vmem:[%s1503_s2 + $0x8] sm:$0xff] }
   0x7   :  { %120 = vmatpush1.bf16.msra.mxu0 %v96_v16  ;;  %v102_v21 = vsel %vm94_vm0, %v48_v11, 0  ;;  %v52_v22 = vpack.c.bf16 %v36_v20, %v36_v20  ;;  %v56_v24 = vld [vmem:[%s1503_s2 + $0x10] sm:$0xff]  ;;  %61 = vperm.xlu0 %1059, %v54_v23   ;;  %v41_v29 = vld [vmem:[%s1502_s1 + $0x18] sm:$0xff] }
   0x8   :  { %181 = vmatpush1.bf16.msra.mxu1 %v102_v21  ;;  %1032 = vmatprep.subr.msk.bf16.mxu0 %vm94_vm0, %v51_v17  ;;  %v108_v25 = vsel %vm94_vm0, %v50_v19, 0  ;;  %v40_v28 = vld [vmem:[%s1502_s1 + $0x10] sm:$0xff]  ;;  %v57_v30 = vld [vmem:[%s1503_s2 + $0x18] sm:$0xff] }
   0x9   :  { %1036 = vmatprep.subr.msk.bf16.mxu1 %vm94_vm0, %v53_v18  ;;  %v114_v26 = vsel %vm94_vm0, %v52_v22, 0  ;;  %71 = vperm.xlu1 %1060, %v56_v24  }
   0xa   :  { %1025 = vmatmul.mubr.msk.bf16.vlgmr.msra.gmra.mrb[0].mxu0 %vm84_vm1, %v1151_v12 }
   0xb   :  { %1029 = vmatmul.mubr.msk.bf16.vlgmr.msra.gmra.mrb[0].mxu1 %vm84_vm1, %v1151_v12  ;;  %161 = vmatprep.mubr.bf16.mxu0 %v1085_v8 }
   0xc   :  { %222 = vmatprep.mubr.bf16.mxu1 %v1085_v8  ;;  %242 = vmatpush1.bf16.msra.mxu0 %v108_v25 }
   0xd   :  { %14 = vsyncpa [#allocation4], 0  ;;  %303 = vmatpush1.bf16.msra.mxu1 %v114_v26  ;;  %66 = vperm.xlu0 %1059, %v55_v27   ;;  %v44_v31 = vpack.c.bf16 %v41_v29, %v40_v28  ;;  %v58_v32 = vld [vmem:[%s1503_s2 + $0x20] sm:$0xff]  ;;  %v436_v34 = vld [vmem:[%s1505_s4 + $0x8] sm:$0xff]  ;;  %vm465_vm2 = vcmask 326656  }
   0xe   :  { %76 = vperm.xlu1 %1060, %v57_v30   ;;  %v435_v33 = vld [vmem:[%s1505_s4] sm:$0xff]  ;;  %v437_v36 = vld [vmem:[%s1505_s4 + $0x10] sm:$0xff]  ;;  %v438_v38 = vld [vmem:[%s1505_s4 + $0x18] sm:$0xff] }
   0xf   :  { %v42_v35 = vld [vmem:[%s1502_s1 + $0x20] sm:$0xff]  ;;  %v784_v40 = vld [vmem:[%s1506_s5 + $0x8] sm:$0xff]  ;;  %v785_v42 = vld [vmem:[%s1506_s5 + $0x10] sm:$0xff] }
  0x10   :  { %v45_v37 = vpack.c.bf16 %v42_v35, %v42_v35  ;;  %v783_v39 = vld [vmem:[%s1506_s5] sm:$0xff]  ;;  %v786_v43 = vld [vmem:[%s1506_s5 + $0x18] sm:$0xff] }
  0x11   :  { %81 = vperm.xlu0 %1059, %v58_v32   ;;  %v439_v41 = vld [vmem:[%s1505_s4 + $0x20] sm:$0xff] }
  0x12   :  { %1026 = vmatmul.mubr.msk.bf16.gmra.mrb[4].mxu0 %vm84_vm1, %v44_v31  ;;  %442 = vperm.xlu1 %1060, %v435_v33   ;;  %v787_v44 = vld [vmem:[%s1506_s5 + $0x20] sm:$0xff] }
  0x13   :  { %1030 = vmatmul.mubr.msk.bf16.gmra.mrb[4].mxu1 %vm84_vm1, %v44_v31  ;;  %171 = vmatprep.mubr.bf16.mxu0 %v1085_v8  ;;  %v933_v45 = vld [vmem:[#allocation2] sm:$0x1] }
  0x14   :  { %232 = vmatprep.mubr.bf16.mxu1 %v1085_v8 }
  0x15   :  { %447 = vperm.xlu0 %1059, %v436_v34  }
  0x16   :  { %452 = vperm.xlu1 %1060, %v437_v36  }
  0x19   :  { %457 = vperm.xlu0 %1059, %v438_v38  }
  0x1a   :  { %1027 = vmatmul.mubr.msk.bf16.gmra.mrb[8].mxu0 %vm84_vm1, %v45_v37  ;;  %790 = vperm.xlu1 %1060, %v783_v39  }
  0x1b   :  { %1031 = vmatmul.mubr.msk.bf16.gmra.mrb[8].mxu1 %vm84_vm1, %v45_v37  ;;  %273 = vmatprep.mubr.bf16.mxu0 %v1085_v8 }
  0x1c   :  { %334 = vmatprep.mubr.bf16.mxu1 %v1085_v8 }
  0x1d   :  { %795 = vperm.xlu0 %1059, %v784_v40  }
  0x1e   :  { %462 = vperm.xlu1 %1060, %v439_v41  }
  0x21   :  { %800 = vperm.xlu0 %1059, %v785_v42  }
  0x22   :  { %1033 = vmatmul.mubr.msk.bf16.vlgmr.msra.gmra.mrb[12].mxu0 %vm84_vm1, %v1151_v12  ;;  %805 = vperm.xlu1 %1060, %v786_v43  }
  0x23   :  { %1037 = vmatmul.mubr.msk.bf16.vlgmr.msra.gmra.mrb[12].mxu1 %vm84_vm1, %v1151_v12  ;;  %283 = vmatprep.mubr.bf16.mxu0 %v1085_v8 }
  0x24   :  { %344 = vmatprep.mubr.bf16.mxu1 %v1085_v8 }
  0x25   :  { %810 = vperm.xlu0 %1059, %v787_v44  }
  0x26   :  { %936 = vperm.xlu1 %1060, %v933_v45  }
  0x2a   :  { %1034 = vmatmul.mubr.msk.bf16.gmra.mrb[16].mxu0 %vm84_vm1, %v44_v31 }
  0x2b   :  { %1038 = vmatmul.mubr.msk.bf16.gmra.mrb[16].mxu1 %vm84_vm1, %v44_v31  ;;  %293 = vmatprep.mubr.bf16.mxu0 %v1085_v8 }
  0x2c   :  { %354 = vmatprep.mubr.bf16.mxu1 %v1085_v8 }
  0x32   :  { %1035 = vmatmul.mubr.msk.bf16.gmra.mrb[20].mxu0 %vm84_vm1, %v45_v37 }
  0x33   :  { %1039 = vmatmul.mubr.msk.bf16.gmra.mrb[20].mxu1 %vm84_vm1, %v45_v37  ;;  %531 = vmatprep.mubr.bf16.mxu0 %v1085_v8 }
  0x34   :  { %592 = vmatprep.mubr.bf16.mxu1 %v1085_v8 }
  0x86   :  { %v1257_v46 = vpop.permute.xlu0 %61 }
  0x88   :  { %v1259_v47 = vpop.permute.xlu1 %71 }
  0x8c   :  { %v1261_v48 = vpop.permute.xlu0 %66 }
  0x8d   :  { %v1271_v11 = vpop.permute.xlu1 %76 }
  0x90   :  { %v1281_v40 = vpop.permute.xlu0 %81 }
  0xdd   :  { %v153_v49 = vpop.f32.mrb[0].mxu0 }
  0xde   :  { %v154_v50 = vadd.f32 %v153_v49, %v1257_v46  ;;  %v214_v51 = vpop.f32.mrb[0].mxu1  ;;  %v155_v52 = vpop.f32.mrb[1].mxu0 }
  0xdf   :  { %v215_v53 = vadd.f32 %v214_v51, %v1257_v46  ;;  %v156_v54 = vadd.f32 %v155_v52, %v1257_v46  ;;  %v216_v55 = vpop.f32.mrb[1].mxu1  ;;  %v157_v56 = vpop.f32.mrb[2].mxu0 }
  0xe0   :  { %v217_v57 = vadd.f32 %v216_v55, %v1257_v46  ;;  %v158_v58 = vadd.f32 %v157_v56, %v1261_v48  ;;  %v218_v59 = vpop.f32.mrb[2].mxu1  ;;  %v159_v60 = vpop.f32.mrb[3].mxu0  ;;  %v363_v0 = vmax.f32 %v154_v50, 0.0 }
  0xe1   :  { %v219_v61 = vadd.f32 %v218_v59, %v1261_v48  ;;  %v160_v62 = vadd.f32 %v159_v60, %v1261_v48  ;;  %v220_v63 = vpop.f32.mrb[3].mxu1  ;;  %v365_v3 = vmax.f32 %v215_v53, 0.0  ;;  %v364_v4 = vmax.f32 %v156_v54, 0.0 }
  0xe2   :  { %v371_v1 = vmax.f32 %v158_v58, 0.0  ;;  %v221_v2 = vadd.f32 %v220_v63, %v1261_v48  ;;  %v366_v7 = vmax.f32 %v217_v57, 0.0 }
  0xe3   :  { %v373_v5 = vmax.f32 %v219_v61, 0.0  ;;  %v372_v6 = vmax.f32 %v160_v62, 0.0 }
  0xe4   :  { %v411_v9 = vpack.c.bf16 %v371_v1, %v363_v0  ;;  %v374_v10 = vmax.f32 %v221_v2, 0.0  ;;  %v403_v0 = vld [vmem:[%s1504_s3] sm:$0xff]  ;;  %v404_v1 = vld [vmem:[%s1504_s3 + $0x8] sm:$0xff] }
  0xe5   :  { %v413_v12 = vpack.c.bf16 %v373_v5, %v365_v3  ;;  %v412_v13 = vpack.c.bf16 %v372_v6, %v364_v4  ;;  %v163_v14 = vpop.f32.mrb[4].mxu0 }
  0xe6   :  { %v414_v15 = vpack.c.bf16 %v374_v10, %v366_v7  ;;  %v164_v16 = vadd.f32 %v163_v14, %v1259_v47  ;;  %v224_v17 = vpop.f32.mrb[4].mxu1  ;;  %v165_v18 = vpop.f32.mrb[5].mxu0 }
  0xe7   :  { %v225_v19 = vadd.f32 %v224_v17, %v1259_v47  ;;  %v166_v20 = vadd.f32 %v165_v18, %v1259_v47  ;;  %v226_v21 = vpop.f32.mrb[5].mxu1  ;;  %v167_v22 = vpop.f32.mrb[6].mxu0  ;;  %499 = vmatprep.subr.bf16.mxu0 %v412_v13 }
  0xe8   :  { %v227_v23 = vadd.f32 %v226_v21, %v1259_v47  ;;  %v168_v24 = vadd.f32 %v167_v22, %v1271_v11  ;;  %v228_v25 = vpop.f32.mrb[6].mxu1  ;;  %560 = vmatprep.subr.bf16.mxu1 %v414_v15  ;;  %v169_v26 = vpop.f32.mrb[7].mxu0  ;;  %500 = vmatpush1.bf16.msra.mxu0 %v411_v9  ;;  %v379_v30 = vmax.f32 %v164_v16, 0.0  ;;  %v1296_v9 = vpack.c.bf16 %v404_v1, %v403_v0 }
  0xe9   :  { %v229_v27 = vadd.f32 %v228_v25, %v1271_v11  ;;  %v170_v28 = vadd.f32 %v169_v26, %v1271_v11  ;;  %v230_v29 = vpop.f32.mrb[7].mxu1  ;;  %561 = vmatpush1.bf16.msra.mxu1 %v413_v12  ;;  %v381_v33 = vmax.f32 %v225_v19, 0.0  ;;  %v380_v34 = vmax.f32 %v166_v20, 0.0 }
  0xea   :  { %v387_v31 = vmax.f32 %v168_v24, 0.0  ;;  %v231_v32 = vadd.f32 %v230_v29, %v1271_v11  ;;  %v382_v37 = vmax.f32 %v227_v23, 0.0 }
  0xeb   :  { %v389_v35 = vmax.f32 %v229_v27, 0.0  ;;  %v388_v36 = vmax.f32 %v170_v28, 0.0  ;;  %v406_v28 = vld [vmem:[%s1504_s3 + $0x18] sm:$0xff] }
  0xec   :  { %v419_v38 = vpack.c.bf16 %v387_v31, %v379_v30  ;;  %v390_v39 = vmax.f32 %v231_v32, 0.0 }
  0xed   :  { %v421_v41 = vpack.c.bf16 %v389_v35, %v381_v33  ;;  %v420_v42 = vpack.c.bf16 %v388_v36, %v380_v34  ;;  %v173_v43 = vpop.f32.mrb[8].mxu0 }
  0xee   :  { %v422_v44 = vpack.c.bf16 %v390_v39, %v382_v37  ;;  %v174_v45 = vadd.f32 %v173_v43, %v1281_v40  ;;  %v234_v49 = vpop.f32.mrb[8].mxu1  ;;  %v175_v50 = vpop.f32.mrb[9].mxu0 }
  0xef   :  { %v235_v51 = vadd.f32 %v234_v49, %v1281_v40  ;;  %v176_v52 = vadd.f32 %v175_v50, %v1281_v40  ;;  %v236_v53 = vpop.f32.mrb[9].mxu1  ;;  %v177_v54 = vpop.f32.mrb[10].mxu0  ;;  %501 = vmatprep.subr.bf16.mxu0 %v420_v42 }
  0xf0   :  { %v395_v55 = vmax.f32 %v174_v45, 0.0  ;;  %v237_v56 = vadd.f32 %v236_v53, %v1281_v40  ;;  %v238_v57 = vpop.f32.mrb[10].mxu1  ;;  %562 = vmatprep.subr.bf16.mxu1 %v422_v44  ;;  %v178_v58 = vpop.f32.mrb[11].mxu0  ;;  %502 = vmatpush1.bf16.msra.mxu0 %v419_v38 }
  0xf1   :  { %v397_v59 = vmax.f32 %v235_v51, 0.0  ;;  %v396_v60 = vmax.f32 %v176_v52, 0.0  ;;  %v239_v61 = vpop.f32.mrb[11].mxu1  ;;  %563 = vmatpush1.bf16.msra.mxu1 %v421_v41 }
  0xf2   :  { %v427_v62 = vpack.c.bf16 %v395_v55, %v395_v55  ;;  %v398_v63 = vmax.f32 %v237_v56, 0.0 }
  0xf3   :  { %v429_v2 = vpack.c.bf16 %v397_v59, %v397_v59  ;;  %v428_v3 = vpack.c.bf16 %v396_v60, %v396_v60 }
  0xf4   :  { %v430_v4 = vpack.c.bf16 %v398_v63, %v398_v63  ;;  %v476_v5 = vsel %vm94_vm0, %v427_v62, 0 }
  0xf5   :  { %v275_v6 = vpop.f32.mrb[12].mxu0  ;;  %1040 = vmatprep.subr.msk.bf16.mxu0 %vm94_vm0, %v428_v3  ;;  %v482_v7 = vsel %vm94_vm0, %v429_v2, 0 }
  0xf6   :  { %v276_v10 = vadd.f32 %v275_v6, %v1257_v46  ;;  %v336_v12 = vpop.f32.mrb[12].mxu1  ;;  %1044 = vmatprep.subr.msk.bf16.mxu1 %vm94_vm0, %v430_v4  ;;  %v277_v13 = vpop.f32.mrb[13].mxu0  ;;  %504 = vmatpush1.bf16.msra.mxu0 %v476_v5 }
  0xf7   :  { %v337_v14 = vadd.f32 %v336_v12, %v1257_v46  ;;  %v278_v15 = vadd.f32 %v277_v13, %v1257_v46  ;;  %v338_v16 = vpop.f32.mrb[13].mxu1  ;;  %565 = vmatpush1.bf16.msra.mxu1 %v482_v7  ;;  %v279_v17 = vpop.f32.mrb[14].mxu0 }
  0xf8   :  { %v339_v18 = vadd.f32 %v338_v16, %v1257_v46  ;;  %v280_v19 = vadd.f32 %v279_v17, %v1261_v48  ;;  %v340_v20 = vpop.f32.mrb[14].mxu1  ;;  %v281_v21 = vpop.f32.mrb[15].mxu0  ;;  %v367_v25 = vmax.f32 %v276_v10, 0.0  ;;  %v405_v46 = vld [vmem:[%s1504_s3 + $0x10] sm:$0xff] }
  0xf9   :  { %v341_v22 = vadd.f32 %v340_v20, %v1261_v48  ;;  %v282_v23 = vadd.f32 %v281_v21, %v1261_v48  ;;  %v342_v24 = vpop.f32.mrb[15].mxu1  ;;  %1041 = vmatmul.mubr.msk.bf16.vlgmr.msra.gmra.mrb[24].mxu0 %vm465_vm2, %v1296_v9  ;;  %v369_v29 = vmax.f32 %v337_v14, 0.0  ;;  %v368_v30 = vmax.f32 %v278_v15, 0.0 }
  0xfa   :  { %v375_v26 = vmax.f32 %v280_v19, 0.0  ;;  %v343_v27 = vadd.f32 %v342_v24, %v1261_v48  ;;  %1045 = vmatmul.mubr.msk.bf16.vlgmr.msra.gmra.mrb[24].mxu1 %vm465_vm2, %v1296_v9  ;;  %541 = vmatprep.mubr.bf16.mxu0 %v1085_v8  ;;  %v370_v48 = vmax.f32 %v339_v18, 0.0  ;;  %v1319_v38 = vpack.c.bf16 %v406_v28, %v405_v46 }
  0xfb   :  { %v377_v31 = vmax.f32 %v341_v22, 0.0  ;;  %v376_v32 = vmax.f32 %v282_v23, 0.0  ;;  %602 = vmatprep.mubr.bf16.mxu1 %v1085_v8 }
  0xfc   :  { %v415_v33 = vpack.c.bf16 %v375_v26, %v367_v25  ;;  %v378_v34 = vmax.f32 %v343_v27, 0.0 }
  0xfd   :  { %v417_v35 = vpack.c.bf16 %v377_v31, %v369_v29  ;;  %v416_v36 = vpack.c.bf16 %v376_v32, %v368_v30  ;;  %v285_v37 = vpop.f32.mrb[16].mxu0  ;;  %v1364_v30 = vpop.permute.xlu1 %442 }
  0xfe   :  { %v418_v39 = vpack.c.bf16 %v378_v34, %v370_v48  ;;  %v286_v41 = vadd.f32 %v285_v37, %v1259_v47  ;;  %v346_v42 = vpop.f32.mrb[16].mxu1  ;;  %v287_v43 = vpop.f32.mrb[17].mxu0 }
  0xff   :  { %v347_v44 = vadd.f32 %v346_v42, %v1259_v47  ;;  %v288_v45 = vadd.f32 %v287_v43, %v1259_v47  ;;  %v348_v49 = vpop.f32.mrb[17].mxu1  ;;  %v289_v50 = vpop.f32.mrb[18].mxu0  ;;  %621 = vmatprep.subr.bf16.mxu0 %v416_v36 }
 0x100   :  { %v349_v51 = vadd.f32 %v348_v49, %v1259_v47  ;;  %v290_v52 = vadd.f32 %v289_v50, %v1271_v11  ;;  %v350_v53 = vpop.f32.mrb[18].mxu1  ;;  %682 = vmatprep.subr.bf16.mxu1 %v418_v39  ;;  %v291_v54 = vpop.f32.mrb[19].mxu0  ;;  %622 = vmatpush1.bf16.msra.mxu0 %v415_v33  ;;  %v383_v58 = vmax.f32 %v286_v41, 0.0  ;;  %v407_v47 = vld [vmem:[%s1504_s3 + $0x20] sm:$0xff]  ;;  %s1087_s3 = smov [#allocation3]  }
 0x101   :  { %v351_v55 = vadd.f32 %v350_v53, %v1271_v11  ;;  %v292_v56 = vadd.f32 %v291_v54, %v1271_v11  ;;  %v352_v57 = vpop.f32.mrb[19].mxu1  ;;  %683 = vmatpush1.bf16.msra.mxu1 %v417_v35  ;;  %1042 = vmatmul.mubr.msk.bf16.gmra.mrb[28].mxu0 %vm465_vm2, %v1319_v38  ;;  %v385_v61 = vmax.f32 %v347_v44, 0.0  ;;  %v384_v62 = vmax.f32 %v288_v45, 0.0  ;;  %v1368_v31 = vpop.permute.xlu1 %452  ;;  %s1016_s14 = sshll.u32 %s1087_s3, 4  ;;  %s1017_s14 = int_to_ptr.vmem [resolvable:$true] %s1016_s14 }
 0x102   :  { %v391_v59 = vmax.f32 %v290_v52, 0.0  ;;  %v353_v60 = vadd.f32 %v352_v57, %v1271_v11  ;;  %1046 = vmatmul.mubr.msk.bf16.gmra.mrb[28].mxu1 %vm465_vm2, %v1319_v38  ;;  %551 = vmatprep.mubr.bf16.mxu0 %v1085_v8  ;;  %v386_v1 = vmax.f32 %v349_v51, 0.0  ;;  %v410_v6 = vpack.c.bf16 %v407_v47, %v407_v47  ;;  %s1061_s15 = scalar_lea.vmem %s1017_s14, 128  ;;  %p1066_p1 = scmp.lt.s32.totalorder %s1017_s14, %s1017_s14 }
 0x103   :  { %v393_v63 = vmax.f32 %v351_v55, 0.0  ;;  %v392_v0 = vmax.f32 %v292_v56, 0.0  ;;  %612 = vmatprep.mubr.bf16.mxu1 %v1085_v8  ;;  %p1062_p0 = scmp.ne.s32.totalorder %s1017_s14, %s1061_s15  ;;  %p1067_p2 = scmp.lt.s32.totalorder %s1061_s15, %s1061_s15 }
 0x104   :  { %v423_v2 = vpack.c.bf16 %v391_v59, %v383_v58  ;;  %v394_v3 = vmax.f32 %v353_v60, 0.0 }
 0x105   :  { %v425_v4 = vpack.c.bf16 %v393_v63, %v385_v61  ;;  %v424_v11 = vpack.c.bf16 %v392_v0, %v384_v62  ;;  %v295_v5 = vpop.f32.mrb[20].mxu0  ;;  %v1372_v48 = vpop.permute.xlu1 %790  ;;  %v1086_v61 = vmov 1966171168   ;;  %p1068_p3 = por %p1067_p2, %p1066_p1 }
 0x106   :  { %v426_v7 = vpack.c.bf16 %v394_v3, %v386_v1  ;;  %v296_v10 = vadd.f32 %v295_v5, %v1281_v40  ;;  %v356_v12 = vpop.f32.mrb[20].mxu1  ;;  %v297_v13 = vpop.f32.mrb[21].mxu0  ;;  %v1386_v62 = vunpack.c.l.s4 %v1086_v61 }
 0x107   :  { %v357_v14 = vadd.f32 %v356_v12, %v1281_v40  ;;  %v298_v15 = vadd.f32 %v297_v13, %v1281_v40  ;;  %v358_v16 = vpop.f32.mrb[21].mxu1  ;;  %v299_v17 = vpop.f32.mrb[22].mxu0  ;;  %623 = vmatprep.subr.bf16.mxu0 %v424_v11  ;;  %p1069_p4 = pnand %p1068_p3, %p1062_p0 }
 0x108   :  { %v399_v18 = vmax.f32 %v296_v10, 0.0  ;;  %v359_v19 = vadd.f32 %v358_v16, %v1281_v40  ;;  %v360_v20 = vpop.f32.mrb[22].mxu1  ;;  %684 = vmatprep.subr.bf16.mxu1 %v426_v7  ;;  %v300_v21 = vpop.f32.mrb[23].mxu0  ;;  %624 = vmatpush1.bf16.msra.mxu0 %v423_v2 }
 0x109   :  { %v401_v22 = vmax.f32 %v357_v14, 0.0  ;;  %v400_v23 = vmax.f32 %v298_v15, 0.0  ;;  %v361_v24 = vpop.f32.mrb[23].mxu1  ;;  %685 = vmatpush1.bf16.msra.mxu1 %v425_v4  ;;  %1043 = vmatmul.mubr.msk.bf16.gmra.mrb[32].mxu0 %vm465_vm2, %v410_v6  ;;  %v1390_v2 = vpop.permute.xlu1 %462 }
 0x10a   :  { %v431_v25 = vpack.c.bf16 %v399_v18, %v399_v18  ;;  %v402_v26 = vmax.f32 %v359_v19, 0.0  ;;  %1047 = vmatmul.mubr.msk.bf16.gmra.mrb[32].mxu1 %vm465_vm2, %v410_v6  ;;  %653 = vmatprep.mubr.bf16.mxu0 %v1085_v8 }
 0x10b   :  { %v433_v27 = vpack.c.bf16 %v401_v22, %v401_v22  ;;  %v432_v46 = vpack.c.bf16 %v400_v23, %v400_v23  ;;  %714 = vmatprep.mubr.bf16.mxu1 %v1085_v8 }
 0x10c   :  { %v434_v40 = vpack.c.bf16 %v402_v26, %v402_v26  ;;  %v488_v28 = vsel %vm94_vm0, %v431_v25, 0 }
 0x10d   :  { %1048 = vmatprep.subr.msk.bf16.mxu0 %vm94_vm0, %v432_v46  ;;  %v494_v29 = vsel %vm94_vm0, %v433_v27, 0 }
 0x10e   :  { %1052 = vmatprep.subr.msk.bf16.mxu1 %vm94_vm0, %v434_v40  ;;  %626 = vmatpush1.bf16.msra.mxu0 %v488_v28 }
 0x10f   :  { %687 = vmatpush1.bf16.msra.mxu1 %v494_v29 }
 0x111   :  { %1049 = vmatmul.mubr.msk.bf16.vlgmr.msra.gmra.mrb[36].mxu0 %vm465_vm2, %v1296_v9 }
 0x112   :  { %1053 = vmatmul.mubr.msk.bf16.vlgmr.msra.gmra.mrb[36].mxu1 %vm465_vm2, %v1296_v9  ;;  %663 = vmatprep.mubr.bf16.mxu0 %v1085_v8  ;;  %v1366_v9 = vpop.permute.xlu0 %447 }
 0x113   :  { %724 = vmatprep.mubr.bf16.mxu1 %v1085_v8 }
 0x116   :  { %v1370_v32 = vpop.permute.xlu0 %457 }
 0x119   :  { %1050 = vmatmul.mubr.msk.bf16.gmra.mrb[40].mxu0 %vm465_vm2, %v1319_v38 }
 0x11a   :  { %1054 = vmatmul.mubr.msk.bf16.gmra.mrb[40].mxu1 %vm465_vm2, %v1319_v38  ;;  %673 = vmatprep.mubr.bf16.mxu0 %v1085_v8  ;;  %v1382_v58 = vpop.permute.xlu0 %795 }
 0x11b   :  { %734 = vmatprep.mubr.bf16.mxu1 %v1085_v8  ;;  %v939_v8 = vlaneseq }
 0x11d   :  { %v1384_v59 = vshrl.u32 %v939_v8, 7 }
 0x11e   :  { %v1403_v46 = vpop.permute.xlu0 %800 }
 0x121   :  { %1051 = vmatmul.mubr.msk.bf16.gmra.mrb[44].mxu0 %vm465_vm2, %v410_v6 }
 0x122   :  { %1055 = vmatmul.mubr.msk.bf16.gmra.mrb[44].mxu1 %vm465_vm2, %v410_v6 }
 0x1cc   :  { %v533_v33 = vpop.f32.mrb[24].mxu0 }
 0x1cd   :  { %v534_v34 = vadd.f32 %v533_v33, %v1364_v30  ;;  %v594_v35 = vpop.f32.mrb[24].mxu1  ;;  %v535_v36 = vpop.f32.mrb[25].mxu0 }
 0x1ce   :  { %v595_v37 = vadd.f32 %v594_v35, %v1364_v30  ;;  %v536_v38 = vadd.f32 %v535_v36, %v1364_v30  ;;  %v596_v39 = vpop.f32.mrb[25].mxu1  ;;  %v537_v41 = vpop.f32.mrb[26].mxu0 }
 0x1cf   :  { %v743_v42 = vmax.f32 %v534_v34, 0.0  ;;  %v597_v43 = vadd.f32 %v596_v39, %v1364_v30  ;;  %v538_v44 = vadd.f32 %v537_v41, %v1366_v9  ;;  %v598_v45 = vpop.f32.mrb[26].mxu1  ;;  %v539_v49 = vpop.f32.mrb[27].mxu0 }
 0x1d0   :  { %v745_v50 = vmax.f32 %v595_v37, 0.0  ;;  %v744_v51 = vmax.f32 %v536_v38, 0.0  ;;  %v599_v52 = vadd.f32 %v598_v45, %v1366_v9  ;;  %v540_v53 = vadd.f32 %v539_v49, %v1366_v9  ;;  %v600_v54 = vpop.f32.mrb[27].mxu1  ;;  %v1409_v38 = vpop.permute.xlu1 %805 }
 0x1d1   :  { %v746_v55 = vmax.f32 %v597_v43, 0.0  ;;  %v751_v56 = vmax.f32 %v538_v44, 0.0  ;;  %v601_v57 = vadd.f32 %v600_v54, %v1366_v9  ;;  %v813_v63 = vmul.f32 %v1372_v48, %v743_v42 }
 0x1d2   :  { %v753_v60 = vmax.f32 %v599_v52, 0.0  ;;  %v752_v47 = vmax.f32 %v540_v53, 0.0  ;;  %v815_v3 = vmul.f32 %v1372_v48, %v745_v50  ;;  %v814_v4 = vmul.f32 %v1372_v48, %v744_v51 }
 0x1d3   :  { %v821_v0 = vmul.f32 %v1382_v58, %v751_v56  ;;  %v754_v1 = vmax.f32 %v601_v57, 0.0  ;;  %v816_v7 = vmul.f32 %v1372_v48, %v746_v55 }
 0x1d4   :  { %v823_v11 = vmul.f32 %v1382_v58, %v753_v60  ;;  %v822_v5 = vmul.f32 %v1382_v58, %v752_v47  ;;  %v543_v6 = vpop.f32.mrb[28].mxu0 }
 0x1d5   :  { %v853_v10 = vadd.f32 %v821_v0, %v813_v63  ;;  %v824_v12 = vmul.f32 %v1382_v58, %v754_v1  ;;  %v544_v13 = vadd.f32 %v543_v6, %v1368_v31  ;;  %v604_v14 = vpop.f32.mrb[28].mxu1  ;;  %v545_v15 = vpop.f32.mrb[29].mxu0 }
 0x1d6   :  { %v873_v16 = vadd.f32 %v823_v11, %v815_v3  ;;  %v863_v17 = vadd.f32 %v822_v5, %v814_v4  ;;  %v605_v18 = vadd.f32 %v604_v14, %v1368_v31  ;;  %v546_v19 = vadd.f32 %v545_v15, %v1368_v31  ;;  %v606_v20 = vpop.f32.mrb[29].mxu1  ;;  %v547_v21 = vpop.f32.mrb[30].mxu0 }
 0x1d7   :  { %v883_v22 = vadd.f32 %v824_v12, %v816_v7  ;;  %v759_v23 = vmax.f32 %v544_v13, 0.0  ;;  %v607_v24 = vadd.f32 %v606_v20, %v1368_v31  ;;  %v548_v25 = vadd.f32 %v547_v21, %v1370_v32  ;;  %v608_v26 = vpop.f32.mrb[30].mxu1  ;;  %v549_v27 = vpop.f32.mrb[31].mxu0 }
 0x1d8   :  { %v761_v40 = vmax.f32 %v605_v18, 0.0  ;;  %v760_v28 = vmax.f32 %v546_v19, 0.0  ;;  %v609_v29 = vadd.f32 %v608_v26, %v1370_v32  ;;  %v550_v33 = vadd.f32 %v549_v27, %v1370_v32  ;;  %v610_v34 = vpop.f32.mrb[31].mxu1  ;;  %v1422_v14 = vpop.permute.xlu0 %810 }
 0x1d9   :  { %v829_v35 = vmul.f32 %v1403_v46, %v759_v23  ;;  %v762_v36 = vmax.f32 %v607_v24, 0.0  ;;  %v767_v8 = vmax.f32 %v548_v25, 0.0  ;;  %v611_v37 = vadd.f32 %v610_v34, %v1370_v32 }
 0x1da   :  { %v831_v39 = vmul.f32 %v1403_v46, %v761_v40  ;;  %v830_v41 = vmul.f32 %v1403_v46, %v760_v28  ;;  %v769_v42 = vmax.f32 %v609_v29, 0.0  ;;  %v768_v43 = vmax.f32 %v550_v33, 0.0 }
 0x1db   :  { %v854_v44 = vadd.f32 %v853_v10, %v829_v35  ;;  %v832_v45 = vmul.f32 %v1403_v46, %v762_v36  ;;  %v837_v49 = vmul.f32 %v1409_v38, %v767_v8  ;;  %v770_v50 = vmax.f32 %v611_v37, 0.0 }
 0x1dc   :  { %v874_v51 = vadd.f32 %v873_v16, %v831_v39  ;;  %v864_v52 = vadd.f32 %v863_v17, %v830_v41  ;;  %v839_v53 = vmul.f32 %v1409_v38, %v769_v42  ;;  %v838_v54 = vmul.f32 %v1409_v38, %v768_v43  ;;  %v553_v55 = vpop.f32.mrb[32].mxu0 }
 0x1dd   :  { %v884_v56 = vadd.f32 %v883_v22, %v832_v45  ;;  %v855_v57 = vadd.f32 %v854_v44, %v837_v49  ;;  %v840_v60 = vmul.f32 %v1409_v38, %v770_v50  ;;  %v554_v47 = vadd.f32 %v553_v55, %v1390_v2  ;;  %v614_v61 = vpop.f32.mrb[32].mxu1  ;;  %v555_v63 = vpop.f32.mrb[33].mxu0 }
 0x1de   :  { %v875_v0 = vadd.f32 %v874_v51, %v839_v53  ;;  %v865_v1 = vadd.f32 %v864_v52, %v838_v54  ;;  %v615_v3 = vadd.f32 %v614_v61, %v1390_v2  ;;  %v556_v4 = vadd.f32 %v555_v63, %v1390_v2  ;;  %v616_v11 = vpop.f32.mrb[33].mxu1  ;;  %v557_v5 = vpop.f32.mrb[34].mxu0 }
 0x1df   :  { %v885_v6 = vadd.f32 %v884_v56, %v840_v60  ;;  %v775_v7 = vmax.f32 %v554_v47, 0.0  ;;  %v617_v10 = vadd.f32 %v616_v11, %v1390_v2  ;;  %v618_v12 = vpop.f32.mrb[34].mxu1  ;;  %v558_v13 = vpop.f32.mrb[35].mxu0  ;;  %v965_v15 = vunpack.c.0.s8 %v1386_v62 }
 0x1e0   :  { %v777_v16 = vmax.f32 %v615_v3, 0.0  ;;  %v776_v17 = vmax.f32 %v556_v4, 0.0  ;;  %v619_v18 = vpop.f32.mrb[35].mxu1  ;;  %v941_v19 = vsub.s32 0, %v1384_v59  ;;  %v937_v22 = vpop.permute.xlu1 %936 }
 0x1e1   :  { %v845_v20 = vmul.f32 %v1422_v14, %v775_v7  ;;  %v778_v21 = vmax.f32 %v617_v10, 0.0  ;;  %v1431_v27 = vsub.s32 %v965_v15, %v1384_v59 }
 0x1e2   :  { %v847_v23 = vmul.f32 %v1422_v14, %v777_v16  ;;  %v846_v24 = vmul.f32 %v1422_v14, %v776_v17  ;;  %v1433_v29 = vrot.slane %v937_v22, %v941_v19 }
 0x1e3   :  { %v856_v25 = vadd.f32 %v855_v57, %v845_v20  ;;  %v848_v26 = vmul.f32 %v1422_v14, %v778_v21 }
 0x1e4   :  { %v876_v62 = vadd.f32 %v875_v0, %v847_v23  ;;  %v866_v40 = vadd.f32 %v865_v1, %v846_v24  ;;  %v655_v28 = vpop.f32.mrb[36].mxu0 }
 0x1e5   :  { %v857_v33 = vrot.slane %v856_v25, 4  ;;  %v886_v34 = vadd.f32 %v885_v6, %v848_v26  ;;  %v656_v35 = vadd.f32 %v655_v28, %v1364_v30  ;;  %v716_v36 = vpop.f32.mrb[36].mxu1  ;;  %v657_v8 = vpop.f32.mrb[37].mxu0 }
 0x1e6   :  { %v877_v37 = vrot.slane %v876_v62, 4  ;;  %v867_v39 = vrot.slane %v866_v40, 4  ;;  %v717_v41 = vadd.f32 %v716_v36, %v1364_v30  ;;  %v658_v42 = vadd.f32 %v657_v8, %v1364_v30  ;;  %v718_v43 = vpop.f32.mrb[37].mxu1  ;;  %v659_v59 = vpop.f32.mrb[38].mxu0 }
 0x1e7   :  { %v858_v44 = vadd.f32 %v857_v33, %v856_v25  ;;  %v887_v45 = vrot.slane %v886_v34, 4  ;;  %v747_v49 = vmax.f32 %v656_v35, 0.0  ;;  %v719_v50 = vadd.f32 %v718_v43, %v1364_v30  ;;  %v720_v51 = vpop.f32.mrb[38].mxu1  ;;  %v661_v52 = vpop.f32.mrb[39].mxu0 }
 0x1e8   :  { %v878_v53 = vadd.f32 %v877_v37, %v876_v62  ;;  %v868_v54 = vadd.f32 %v867_v39, %v866_v40  ;;  %v749_v55 = vmax.f32 %v717_v41, 0.0  ;;  %v748_v56 = vmax.f32 %v658_v42, 0.0  ;;  %v722_v57 = vpop.f32.mrb[39].mxu1 }
 0x1e9   :  { %v859_v60 = vrot.slane %v858_v44, 2  ;;  %v888_v47 = vadd.f32 %v887_v45, %v886_v34  ;;  %v817_v61 = vmul.f32 %v1372_v48, %v747_v49  ;;  %v750_v63 = vmax.f32 %v719_v50, 0.0 }
 0x1ea   :  { %v879_v0 = vrot.slane %v878_v53, 2  ;;  %v869_v1 = vrot.slane %v868_v54, 2  ;;  %v819_v3 = vmul.f32 %v1372_v48, %v749_v55  ;;  %v818_v4 = vmul.f32 %v1372_v48, %v748_v56 }
 0x1eb   :  { %v860_v11 = vadd.f32 %v859_v60, %v858_v44  ;;  %v889_v30 = vrot.slane %v888_v47, 2  ;;  %v820_v5 = vmul.f32 %v1372_v48, %v750_v63  ;;  %v660_v6 = vadd.f32 %v659_v59, %v1366_v9 }
 0x1ec   :  { %v880_v7 = vadd.f32 %v879_v0, %v878_v53  ;;  %v870_v10 = vadd.f32 %v869_v1, %v868_v54  ;;  %v721_v12 = vadd.f32 %v720_v51, %v1366_v9  ;;  %v662_v13 = vadd.f32 %v661_v52, %v1366_v9  ;;  %v665_v15 = vpop.f32.mrb[40].mxu0 }
 0x1ed   :  { %v861_v16 = vrot.slane %v860_v11, 1  ;;  %v890_v17 = vadd.f32 %v889_v30, %v888_v47  ;;  %v755_v18 = vmax.f32 %v660_v6, 0.0  ;;  %v723_v19 = vadd.f32 %v722_v57, %v1366_v9  ;;  %v726_v20 = vpop.f32.mrb[40].mxu1  ;;  %v667_v21 = vpop.f32.mrb[41].mxu0 }
 0x1ee   :  { %v881_v22 = vrot.slane %v880_v7, 1  ;;  %v871_v23 = vrot.slane %v870_v10, 1  ;;  %v757_v24 = vmax.f32 %v721_v12, 0.0  ;;  %v756_v48 = vmax.f32 %v662_v13, 0.0  ;;  %v728_v25 = vpop.f32.mrb[41].mxu1  ;;  %v669_v26 = vpop.f32.mrb[42].mxu0 }
 0x1ef   :  { %v862_v62 = vadd.f32 %v861_v16, %v860_v11  ;;  %v891_v40 = vrot.slane %v890_v17, 1  ;;  %v825_v28 = vmul.f32 %v1382_v58, %v755_v18  ;;  %v758_v33 = vmax.f32 %v723_v19, 0.0  ;;  %v730_v34 = vpop.f32.mrb[42].mxu1  ;;  %v671_v35 = vpop.f32.mrb[43].mxu0 }
 0x1f0   :  { %v882_v36 = vadd.f32 %v881_v22, %v880_v7  ;;  %v872_v8 = vadd.f32 %v871_v23, %v870_v10  ;;  %v827_v37 = vmul.f32 %v1382_v58, %v757_v24  ;;  %v826_v9 = vmul.f32 %v1382_v58, %v756_v48  ;;  %v732_v39 = vpop.f32.mrb[43].mxu1 }
 0x1f1   :  { %v892_v41 = vadd.f32 %v891_v40, %v890_v17  ;;  %v893_v42 = vadd.f32 %v825_v28, %v817_v61  ;;  %v828_v43 = vmul.f32 %v1382_v58, %v758_v33  ;;  %v666_v59 = vadd.f32 %v665_v15, %v1368_v31 }
 0x1f2   :  { %v913_v44 = vadd.f32 %v827_v37, %v819_v3  ;;  %v903_v45 = vadd.f32 %v826_v9, %v818_v4  ;;  %v727_v49 = vadd.f32 %v726_v20, %v1368_v31  ;;  %v668_v50 = vadd.f32 %v667_v21, %v1368_v31 }
 0x1f3   :  { %v923_v51 = vadd.f32 %v828_v43, %v820_v5  ;;  %v763_v52 = vmax.f32 %v666_v59, 0.0  ;;  %v729_v53 = vadd.f32 %v728_v25, %v1368_v31  ;;  %v670_v54 = vadd.f32 %v669_v26, %v1370_v32 }
 0x1f4   :  { %v765_v55 = vmax.f32 %v727_v49, 0.0  ;;  %v764_v56 = vmax.f32 %v668_v50, 0.0  ;;  %v731_v57 = vadd.f32 %v730_v34, %v1370_v32  ;;  %v672_v58 = vadd.f32 %v671_v35, %v1370_v32  ;;  %v675_v60 = vpop.f32.mrb[44].mxu0 }
 0x1f5   :  { %v833_v47 = vmul.f32 %v1403_v46, %v763_v52  ;;  %v766_v61 = vmax.f32 %v729_v53, 0.0  ;;  %v771_v63 = vmax.f32 %v670_v54, 0.0  ;;  %v733_v0 = vadd.f32 %v732_v39, %v1370_v32  ;;  %v736_v1 = vpop.f32.mrb[44].mxu1  ;;  %v677_v3 = vpop.f32.mrb[45].mxu0 }
 0x1f6   :  { %v835_v4 = vmul.f32 %v1403_v46, %v765_v55  ;;  %v834_v31 = vmul.f32 %v1403_v46, %v764_v56  ;;  %v773_v11 = vmax.f32 %v731_v57, 0.0  ;;  %v772_v30 = vmax.f32 %v672_v58, 0.0  ;;  %v738_v5 = vpop.f32.mrb[45].mxu1  ;;  %v679_v6 = vpop.f32.mrb[46].mxu0 }
 0x1f7   :  { %v894_v7 = vadd.f32 %v893_v42, %v833_v47  ;;  %v836_v10 = vmul.f32 %v1403_v46, %v766_v61  ;;  %v841_v12 = vmul.f32 %v1409_v38, %v771_v63  ;;  %v774_v13 = vmax.f32 %v733_v0, 0.0  ;;  %v740_v15 = vpop.f32.mrb[46].mxu1  ;;  %v680_v16 = vpop.f32.mrb[47].mxu0 }
 0x1f8   :  { %v914_v17 = vadd.f32 %v913_v44, %v835_v4  ;;  %v904_v32 = vadd.f32 %v903_v45, %v834_v31  ;;  %v843_v18 = vmul.f32 %v1409_v38, %v773_v11  ;;  %v842_v19 = vmul.f32 %v1409_v38, %v772_v30  ;;  %v741_v20 = vpop.f32.mrb[47].mxu1 }
 0x1f9   :  { %v924_v21 = vadd.f32 %v923_v51, %v836_v10  ;;  %v895_v22 = vadd.f32 %v894_v7, %v841_v12  ;;  %v844_v23 = vmul.f32 %v1409_v38, %v774_v13  ;;  %v676_v24 = vadd.f32 %v675_v60, %v1390_v2 }
 0x1fa   :  { %v915_v48 = vadd.f32 %v914_v17, %v843_v18  ;;  %v905_v46 = vadd.f32 %v904_v32, %v842_v19  ;;  %v737_v25 = vadd.f32 %v736_v1, %v1390_v2  ;;  %v678_v26 = vadd.f32 %v677_v3, %v1390_v2 }
 0x1fb   :  { %v925_v40 = vadd.f32 %v924_v21, %v844_v23  ;;  %v779_v28 = vmax.f32 %v676_v24, 0.0  ;;  %v739_v33 = vadd.f32 %v738_v5, %v1390_v2  ;;  %v943_v34 = vadd.f32 %v1433_v29, %v862_v62 }
 0x1fc   :  { %v781_v35 = vmax.f32 %v737_v25, 0.0  ;;  %v780_v37 = vmax.f32 %v678_v26, 0.0  ;;  %v944_v9 = vadd.f32 %v1433_v29, %v872_v8  ;;  %v945_v38 = vadd.f32 %v1433_v29, %v882_v36 }
 0x1fd   :  { %v849_v39 = vmul.f32 %v1422_v14, %v779_v28  ;;  %v782_v42 = vmax.f32 %v739_v33, 0.0  ;;  %v946_v43 = vadd.f32 %v1433_v29, %v892_v41 }
 0x1fe   :  { %v851_v59 = vmul.f32 %v1422_v14, %v781_v35  ;;  %v850_v44 = vmul.f32 %v1422_v14, %v780_v37  ;;  %v959_v45 = vcombine.low %v943_v34, %v944_v9 }
 0x1ff   :  { %v896_v49 = vadd.f32 %v895_v22, %v849_v39  ;;  %v852_v2 = vmul.f32 %v1422_v14, %v782_v42  ;;  %v960_v62 = vcombine.low %v945_v38, %v946_v43 }
 0x200   :  { %v916_v50 = vadd.f32 %v915_v48, %v851_v59  ;;  %v906_v51 = vadd.f32 %v905_v46, %v850_v44  ;;  %v969_v8 = vrot.slane %v959_v45, %v1431_v27 }
 0x201   :  { %v897_v52 = vrot.slane %v896_v49, 4  ;;  %v926_v36 = vadd.f32 %v925_v40, %v852_v2  ;;  %v976_v53 = vrot.slane %v960_v62, %v1431_v27 }
 0x202   :  { %v917_v54 = vrot.slane %v916_v50, 4  ;;  %v907_v55 = vrot.slane %v906_v51, 4 }
 0x203   :  { %v898_v41 = vadd.f32 %v897_v52, %v896_v49  ;;  %v927_v56 = vrot.slane %v926_v36, 4  ;;  %v991_v57 = vcombine.low %v969_v8, %v976_v53 }
 0x204   :  { %v918_v58 = vadd.f32 %v917_v54, %v916_v50  ;;  %v908_v60 = vadd.f32 %v907_v55, %v906_v51 }
 0x205   :  { %v899_v47 = vrot.slane %v898_v41, 2  ;;  %v928_v61 = vadd.f32 %v927_v56, %v926_v36  ;;  %v999_v23 = vrot.slane %v991_v57, %v1431_v27 }
 0x206   :  { %v919_v63 = vrot.slane %v918_v58, 2  ;;  %v909_v14 = vrot.slane %v908_v60, 2 }
 0x207   :  { %v900_v0 = vadd.f32 %v899_v47, %v898_v41  ;;  %v929_v1 = vrot.slane %v928_v61, 2 }
 0x208   :  { %v920_v3 = vadd.f32 %v919_v63, %v918_v58  ;;  %v910_v4 = vadd.f32 %v909_v14, %v908_v60 }
 0x209   :  { %v901_v31 = vrot.slane %v900_v0, 1  ;;  %v930_v11 = vadd.f32 %v929_v1, %v928_v61 }
 0x20a   :  { %v921_v30 = vrot.slane %v920_v3, 1  ;;  %v911_v5 = vrot.slane %v910_v4, 1 }
 0x20b   :  { %v902_v6 = vadd.f32 %v901_v31, %v900_v0  ;;  %v931_v7 = vrot.slane %v930_v11, 1 }
 0x20c   :  { %v922_v10 = vadd.f32 %v921_v30, %v920_v3  ;;  %v912_v12 = vadd.f32 %v911_v5, %v910_v4 }
 0x20d   :  { %v932_v13 = vadd.f32 %v931_v7, %v930_v11  ;;  %v947_v15 = vadd.f32 %v1433_v29, %v902_v6 }
 0x20e   :  { %v948_v16 = vadd.f32 %v1433_v29, %v912_v12  ;;  %v949_v17 = vadd.f32 %v1433_v29, %v922_v10 }
 0x20f   :  { %v950_v32 = vadd.f32 %v1433_v29, %v932_v13 }
 0x210   :  { %v961_v18 = vcombine.low %v947_v15, %v948_v16 }
 0x211   :  { %v962_v19 = vcombine.low %v949_v17, %v950_v32 }
 0x212   :  { %v983_v20 = vrot.slane %v961_v18, %v1431_v27 }
 0x213   :  { %v990_v21 = vrot.slane %v962_v19, %v1431_v27 }
 0x215   :  { %v992_v22 = vcombine.low %v983_v20, %v990_v21 }
 0x217   :  { %v1006_v24 = vrot.slane %v992_v22, %v1431_v27 }
 0x219   :  { %v1007_v48 = vcombine.low %v999_v23, %v1006_v24 }
 0x21b   :  { %1009 = vst [vmem:[#allocation3] sm:$0xff] %v1007_v48 }
 0x21c   :  { %1072 = shalt.err (!%p1069_p4)
}
 0x21d   :  { %s1073_s17 = scalar_lea.hbm %s1508_s7, 128 }
 0x21e   :  { %p1074_p5 = scmp.ne.s32.totalorder %s1508_s7, %s1073_s17  ;;  %p1077_p6 = scmp.lt.u32.totalorder %s1073_s17, %s1508_s7 }
 0x220   :  { %p1079_p7 = pnand %p1077_p6, %p1074_p5 }
 0x222   :  { %1082 = shalt.err (!%p1079_p7)
}
 0x223   :  { %1019 = dma.vmem_to_hbm [thread:$0]  %s1017_s14, 128, %s1508_s7, [#allocation4]  }
 0x224   :  { %1083 = dma.done.wait [#allocation4], 128  }
 0x225   :  { %1084 = vsyncadd [#allocation4], 4294967168 }
 0x226   :  { %1023 = vsyncpa [#allocation4], 1 }

</bundles_post_ra>
